<compile_context>
chip_gen: v7x
topology: tpu7x:2x2x1
jax: 0.10.0
libtpu: 0.0.40
codegen_flags: <defaults>
</compile_context>

<pallas_src>
import jax
import jax.numpy as jnp
from jax.experimental import pallas as pl
from jax.experimental.pallas import tpu as pltpu

LATENT_DIM = 8            # M
HIDDEN_DIM = 32
IMG_H = IMG_W = 28
OUT_DIM = IMG_H * IMG_W   # 784
OUT_PAD = 896             # 7 * 128  -> lane-dense output stores
MAX_TB = 1024             # batch tile; ~7 MiB of double-buffered VMEM (fits v5e/v6e/v7x)


def bernoulli_decoder_kernel(z_ref, w1_ref, b1_ref, w2_ref, b2_ref, logits_ref):
    """Fused decoder MLP; emits ContinuousBernoulli logits.

    z_ref:      (TB, M)        f32
    w1_ref:     (M, H)         f32
    b1_ref:     (1, H)         f32
    w2_ref:     (H, OUT_PAD)   f32 (columns >= 784 are zero padding)
    b2_ref:     (1, OUT_PAD)   f32
    logits_ref: (TB, OUT_PAD)  f32
    """
    # hidden layer: bf16 operands, f32 accumulation (MXU-native on v6e/v7x)
    z = z_ref[...].astype(jnp.bfloat16)
    w1 = w1_ref[...].astype(jnp.bfloat16)
    h = jnp.dot(z, w1, preferred_element_type=jnp.float32) + b1_ref[...]
    h = jnp.maximum(h, 0.0)  # ReLU

    # output layer -> Bernoulli logits
    w2 = w2_ref[...].astype(jnp.bfloat16)
    logits = jnp.dot(h.astype(jnp.bfloat16), w2,
                     preferred_element_type=jnp.float32) + b2_ref[...]
    logits_ref[...] = logits


def _reference_forward(z, params):
    """Plain-JAX (XLA-fused) path for tiny batches."""
    w1, b1, w2, b2 = params
    B = z.shape[0]
    h = jnp.maximum(z @ w1 + b1, 0.0)
    logits = (h @ w2 + b2).reshape(B, 1, IMG_H, IMG_W)
    return logits, jax.nn.sigmoid(logits)


def bernoulli_decoder_forward(z, params, *, min_pallas_batch=0):
    """Returns (logits, probs) of the ContinuousBernoulli distribution, NCHW.

    For batches smaller than `min_pallas_batch` the kernel-launch overhead
    dominates, so we fall back to the XLA-fused path.  The demo keeps it at 0
    so the Pallas kernel is always exercised.
    """
    B, M = z.shape
    if B < min_pallas_batch:
        return _reference_forward(z, params)

    w1, b1, w2, b2 = params

    # Batch tile: sublane-aligned (multiple of 8), capped at MAX_TB.
    TB = min(MAX_TB, max(8, ((B + 7) // 8) * 8))
    B_pad = pl.cdiv(B, TB) * TB
    if B_pad != B:
        z = jnp.pad(z, ((0, B_pad - B), (0, 0)))

    # Lane-dense output padding: 784 -> 896 (zero columns, sliced off below).
    w2p = jnp.pad(w2, ((0, 0), (0, OUT_PAD - OUT_DIM)))
    b2p = jnp.pad(b2, ((0, 0), (0, OUT_PAD - OUT_DIM)))

    cost = pl.CostEstimate(
        flops=2 * B_pad * (M * HIDDEN_DIM + HIDDEN_DIM * OUT_PAD),
        transcendentals=0,
        bytes_accessed=4 * (B_pad * M + M * HIDDEN_DIM + HIDDEN_DIM
                            + HIDDEN_DIM * OUT_PAD + OUT_PAD
                            + B_pad * OUT_PAD),
    )

    logits_flat = pl.pallas_call(
        bernoulli_decoder_kernel,
        out_shape=jax.ShapeDtypeStruct((B_pad, OUT_PAD), jnp.float32),
        grid=(B_pad // TB,),
        in_specs=[
            pl.BlockSpec((TB, M), lambda i: (i, 0)),                 # z tile
            pl.BlockSpec((M, HIDDEN_DIM), lambda i: (0, 0)),         # w1 (resident)
            pl.BlockSpec((1, HIDDEN_DIM), lambda i: (0, 0)),         # b1
            pl.BlockSpec((HIDDEN_DIM, OUT_PAD), lambda i: (0, 0)),   # w2 (resident)
            pl.BlockSpec((1, OUT_PAD), lambda i: (0, 0)),            # b2
        ],
        out_specs=pl.BlockSpec((TB, OUT_PAD), lambda i: (i, 0)),
        compiler_params=pltpu.CompilerParams(
            dimension_semantics=("parallel",),   # v7x: shard batch over 2 TCs
        ),
        cost_estimate=cost,
    )(z, w1, b1, w2p, b2p)

    # NCHW output, event shape (1, 28, 28) -> td.Independent(..., 3)
    logits = logits_flat[:B, :OUT_DIM].reshape(B, 1, IMG_H, IMG_W)
    # ContinuousBernoulli `probs` parameterization; single XLA elementwise op,
    # kept out of the kernel so HBM writeback is not doubled.
    probs = jax.nn.sigmoid(logits)
    return logits, probs


def make_params(key):
    k1, k2, k3, k4 = jax.random.split(key, 4)
    w1 = jax.random.normal(k1, (LATENT_DIM, HIDDEN_DIM), jnp.float32) * 0.1
    b1 = jax.random.normal(k2, (1, HIDDEN_DIM), jnp.float32) * 0.01
    w2 = jax.random.normal(k3, (HIDDEN_DIM, OUT_DIM), jnp.float32) * 0.1
    b2 = jax.random.normal(k4, (1, OUT_DIM), jnp.float32) * 0.01
    # `self.std` parameter from __init__ (unused in forward), kept for fidelity.
    std = jnp.ones((IMG_H, IMG_W), jnp.float32) * 0.5
    return (w1, b1, w2, b2), std


if __name__ == "__main__":
    key = jax.random.PRNGKey(0)
    kz, kp = jax.random.split(key)
    params, std = make_params(kp)

    B = 2
    z = jax.random.normal(kz, (B, LATENT_DIM), jnp.float32)

    logits, probs = bernoulli_decoder_forward(z, params)
    jax.block_until_ready((logits, probs))

    # sanity check against plain-JAX f32 reference (kernel uses bf16 matmul
    # operands with f32 accumulation, so allow a loose tolerance)
    logits_ref, probs_ref = _reference_forward(z, params)
    assert logits.shape == (B, 1, IMG_H, IMG_W)
    assert jnp.allclose(logits, logits_ref, atol=1e-2, rtol=1e-2)
    assert jnp.allclose(probs, probs_ref, atol=1e-2, rtol=1e-2)

    # TODO(synk): td.Independent(td.ContinuousBernoulli(...), 3) is a
    # distribution object (sampling / log_prob); only its parameters
    # (logits, probs) are materialized here.
    print("KERNEL_OK")
</pallas_src>

<mosaic_0001>
module attributes {stable_mosaic.version = 11 : i64} {
  func.func @bernoulli_decoder_kernel(%arg0: i32, %arg1: memref<8x8xf32, #tpu.memory_space<vmem>>, %arg2: memref<8x32xf32, #tpu.memory_space<vmem>>, %arg3: memref<1x32xf32, #tpu.memory_space<vmem>>, %arg4: memref<32x896xf32, #tpu.memory_space<vmem>>, %arg5: memref<1x896xf32, #tpu.memory_space<vmem>>, %arg6: memref<8x896xf32, #tpu.memory_space<vmem>>) attributes {dimension_semantics = [#tpu.dimension_semantics<parallel>], iteration_bounds = array<i64: 1>, scalar_prefetch = 0 : i64, scratch_operands = 0 : i64, tpu.core_type = #tpu.core_type<tc>, window_params = [{transform_indices = @transform_0, window_bounds = array<i64: 8, 8>}, {pipeline_mode = #tpu.pipeline_mode<synchronous>, transform_indices = @transform_1, window_bounds = array<i64: 8, 32>}, {pipeline_mode = #tpu.pipeline_mode<synchronous>, transform_indices = @transform_2, window_bounds = array<i64: 1, 32>}, {pipeline_mode = #tpu.pipeline_mode<synchronous>, transform_indices = @transform_3, window_bounds = array<i64: 32, 896>}, {pipeline_mode = #tpu.pipeline_mode<synchronous>, transform_indices = @transform_4, window_bounds = array<i64: 1, 896>}, {transform_indices = @transform_5, window_bounds = array<i64: 8, 896>}]} {
    %c0 = arith.constant 0 : index
    %c0_0 = arith.constant 0 : index
    %0 = vector.load %arg1[%c0, %c0_0] : memref<8x8xf32, #tpu.memory_space<vmem>>, vector<8x8xf32>
    %1 = arith.truncf %0 : vector<8x8xf32> to vector<8x8xbf16>
    %c0_1 = arith.constant 0 : index
    %c0_2 = arith.constant 0 : index
    %2 = vector.load %arg2[%c0_1, %c0_2] : memref<8x32xf32, #tpu.memory_space<vmem>>, vector<8x32xf32>
    %3 = arith.truncf %2 : vector<8x32xf32> to vector<8x32xbf16>
    %cst = arith.constant dense<0.000000e+00> : vector<8x32xf32>
    %4 = tpu.matmul %1, %3, %cst {dimension_numbers = #tpu.dot_dimension_numbers<[1], [0], [0], [1], [0, 0, 1, 1], [], []>} : vector<8x8xbf16>, vector<8x32xbf16>, vector<8x32xf32> -> vector<8x32xf32>
    %c0_3 = arith.constant 0 : index
    %c0_4 = arith.constant 0 : index
    %5 = vector.load %arg3[%c0_3, %c0_4] : memref<1x32xf32, #tpu.memory_space<vmem>>, vector<1x32xf32>
    %6 = vector.broadcast %5 : vector<1x32xf32> to vector<8x32xf32>
    %7 = arith.addf %4, %6 : vector<8x32xf32>
    %cst_5 = arith.constant 0.000000e+00 : f32
    %8 = vector.broadcast %cst_5 : f32 to vector<8x32xf32>
    %9 = arith.maximumf %7, %8 : vector<8x32xf32>
    %c0_6 = arith.constant 0 : index
    %c0_7 = arith.constant 0 : index
    %10 = vector.load %arg4[%c0_6, %c0_7] : memref<32x896xf32, #tpu.memory_space<vmem>>, vector<32x896xf32>
    %11 = arith.truncf %10 : vector<32x896xf32> to vector<32x896xbf16>
    %12 = arith.truncf %9 : vector<8x32xf32> to vector<8x32xbf16>
    %cst_8 = arith.constant dense<0.000000e+00> : vector<8x896xf32>
    %13 = tpu.matmul %12, %11, %cst_8 {dimension_numbers = #tpu.dot_dimension_numbers<[1], [0], [0], [1], [0, 0, 1, 1], [], []>} : vector<8x32xbf16>, vector<32x896xbf16>, vector<8x896xf32> -> vector<8x896xf32>
    %c0_9 = arith.constant 0 : index
    %c0_10 = arith.constant 0 : index
    %14 = vector.load %arg5[%c0_9, %c0_10] : memref<1x896xf32, #tpu.memory_space<vmem>>, vector<1x896xf32>
    %15 = vector.broadcast %14 : vector<1x896xf32> to vector<8x896xf32>
    %16 = arith.addf %13, %15 : vector<8x896xf32>
    %c0_11 = arith.constant 0 : index
    %c0_12 = arith.constant 0 : index
    %17 = vector.load %arg6[%c0_11, %c0_12] : memref<8x896xf32, #tpu.memory_space<vmem>>, vector<8x896xf32>
    tpu.vector_store %arg6[%c0_11, %c0_12], %16 {strides = array<i32>} : memref<8x896xf32, #tpu.memory_space<vmem>>, vector<8x896xf32>,
    return
  }
  func.func @transform_0(%arg0: i32) -> (i32, i32) {
    %c0_i32 = arith.constant 0 : i32
    %c0_i32_0 = arith.constant 0 : i32
    return %arg0, %c0_i32 : i32, i32
  }
  func.func @transform_1(%arg0: i32) -> (i32, i32) {
    %c0_i32 = arith.constant 0 : i32
    %c0_i32_0 = arith.constant 0 : i32
    %c0_i32_1 = arith.constant 0 : i32
    return %c0_i32, %c0_i32_0 : i32, i32
  }
  func.func @transform_2(%arg0: i32) -> (i32, i32) {
    %c0_i32 = arith.constant 0 : i32
    %c0_i32_0 = arith.constant 0 : i32
    %c0_i32_1 = arith.constant 0 : i32
    return %c0_i32, %c0_i32_0 : i32, i32
  }
  func.func @transform_3(%arg0: i32) -> (i32, i32) {
    %c0_i32 = arith.constant 0 : i32
    %c0_i32_0 = arith.constant 0 : i32
    %c0_i32_1 = arith.constant 0 : i32
    return %c0_i32, %c0_i32_0 : i32, i32
  }
  func.func @transform_4(%arg0: i32) -> (i32, i32) {
    %c0_i32 = arith.constant 0 : i32
    %c0_i32_0 = arith.constant 0 : i32
    %c0_i32_1 = arith.constant 0 : i32
    return %c0_i32, %c0_i32_0 : i32, i32
  }
  func.func @transform_5(%arg0: i32) -> (i32, i32) {
    %c0_i32 = arith.constant 0 : i32
    %c0_i32_0 = arith.constant 0 : i32
    return %arg0, %c0_i32 : i32, i32
  }
}

</mosaic_0001>

<bundles_post_ra>
// kernel: tpu_custom_call.1
= control target key start
LH: loop header
LB: loop body
LE: loop exit
PB: predicated region body
PF: predicated region fallthrough
CT: control target
= control target key end

     0   :  { %10 = vsyncpa [#allocation3], 0  ;;  %s621_s0 = inlined_call_operand.hbm [shape: f32[8,8], index: 0, kind: input, shape index: {}]   ;;  %s622_s1 = inlined_call_operand.hbm [shape: f32[8,32], index: 1, kind: input, shape index: {}]   ;;  %s623_s2 = inlined_call_operand.vmem [shape: f32[1,32], index: 2, kind: input, shape index: {}]   ;;  %s624_s3 = inlined_call_operand.hbm [shape: f32[32,896], index: 3, kind: input, shape index: {}]   ;;  %s625_s4 = inlined_call_operand.vmem [shape: f32[1,896], index: 4, kind: input, shape index: {}]   ;;  %s626_s5 = inlined_call_operand.hbm [shape: f32[8,896], index: 5, kind: output, shape index: {}]  }
   0x1   :  { %11 = vsyncpa [#allocation6], 0 }
   0x2   :  { %12 = vsyncpa [#allocation4], 0  ;;  %s517_s18 = smov [#allocation5]   ;;  %s518_s20 = smov [#allocation2]  }
   0x3   :  { %s29_s19 = sshll.u32 %s517_s18, 4  ;;  %s19_s21 = sshll.u32 %s518_s20, 4  ;;  %s30_s19 = int_to_ptr.vmem [resolvable:$true] %s29_s19  ;;  %s20_s21 = int_to_ptr.vmem [resolvable:$true] %s19_s21 }
   0x4   :  { %s423_s24 = scalar_lea.hbm %s622_s1, 128 }
   0x5   :  { %p424_p0 = scmp.ne.s32.totalorder %s622_s1, %s423_s24  ;;  %p427_p1 = scmp.lt.u32.totalorder %s423_s24, %s622_s1 }
   0x7   :  { %p429_p2 = pnand %p427_p1, %p424_p0 }
   0x9   :  { %432 = shalt.err (!%p429_p2)
}
   0xa   :  { %s433_s29 = scalar_lea.vmem %s30_s19, 128  ;;  %p438_p4 = scmp.lt.s32.totalorder %s30_s19, %s30_s19 }
   0xb   :  { %p434_p3 = scmp.ne.s32.totalorder %s30_s19, %s433_s29  ;;  %p439_p5 = scmp.lt.s32.totalorder %s433_s29, %s433_s29 }
   0xd   :  { %p440_p6 = por %p439_p5, %p438_p4 }
   0xf   :  { %p441_p7 = pnand %p440_p6, %p434_p3 }
  0x11   :  { %444 = shalt.err (!%p441_p7)
}
  0x12   :  { %32 = dma.hbm_to_vmem [thread:$0]  %s622_s1, 128, %s30_s19, [#allocation6]  }
  0x13   :  { %s445_s9 = scalar_lea.hbm %s621_s0, 128 }
  0x14   :  { %p446_p8 = scmp.ne.s32.totalorder %s621_s0, %s445_s9  ;;  %p449_p9 = scmp.lt.u32.totalorder %s445_s9, %s621_s0 }
  0x16   :  { %p451_p10 = pnand %p449_p9, %p446_p8 }
  0x18   :  { %454 = shalt.err (!%p451_p10)
}
  0x19   :  { %s455_s14 = scalar_lea.vmem %s20_s21, 128  ;;  %p460_p12 = scmp.lt.s32.totalorder %s20_s21, %s20_s21 }
  0x1a   :  { %p456_p11 = scmp.ne.s32.totalorder %s20_s21, %s455_s14  ;;  %p461_p13 = scmp.lt.s32.totalorder %s455_s14, %s455_s14 }
  0x1c   :  { %p462_p0 = por %p461_p13, %p460_p12 }
  0x1e   :  { %p463_p1 = pnand %p462_p0, %p456_p11 }
  0x20   :  { %466 = shalt.err (!%p463_p1)
}
  0x21   :  { %22 = dma.hbm_to_vmem [thread:$0]  %s621_s0, 128, %s20_s21, [#allocation3]  }
  0x22   :  { %s519_s16 = smov [#allocation7]   ;;  %s467_s20 = scalar_lea.hbm %s624_s3, 3584 }
  0x23   :  { %s40_s17 = sshll.u32 %s519_s16, 4  ;;  %p468_p2 = scmp.ne.s32.totalorder %s624_s3, %s467_s20  ;;  %s41_s17 = int_to_ptr.vmem [resolvable:$true] %s40_s17 }
  0x24   :  { %p471_p3 = scmp.lt.u32.totalorder %s467_s20, %s624_s3 }
  0x26   :  { %p473_p4 = pnand %p471_p3, %p468_p2 }
  0x28   :  { %476 = shalt.err (!%p473_p4)
}
  0x29   :  { %s477_s26 = scalar_lea.vmem %s41_s17, 3584  ;;  %p482_p6 = scmp.lt.s32.totalorder %s41_s17, %s41_s17 }
  0x2a   :  { %p478_p5 = scmp.ne.s32.totalorder %s41_s17, %s477_s26  ;;  %p483_p7 = scmp.lt.s32.totalorder %s477_s26, %s477_s26 }
  0x2c   :  { %p484_p8 = por %p483_p7, %p482_p6 }
  0x2e   :  { %p485_p9 = pnand %p484_p8, %p478_p5 }
  0x30   :  { %488 = shalt.err (!%p485_p9)
}
  0x31   :  { %s520_s0 = smov 896   ;;  %s521_s21 = smov 56  }
  0x32   :  { %46 = dma.hbm_to_vmem [thread:$0]  %s624_s3, 3584, %s41_s17, [#allocation6], %s520_s0, %s520_s0, %s521_s21  }
  0x33   :  { %511 = dma.done.wait [#allocation3], 128  }
  0x34   :  { %512 = vsyncadd [#allocation3], 4294967168 }
  0x35   :  { %513 = dma.done.wait [#allocation6], 3712  }
  0x36   :  { %514 = vsyncadd [#allocation6], 4294963584  ;;  %v522_v0 = vmov 0.0   ;;  %vm523_vm0 = vmmov 0   ;;  %v61_v1 = vld [vmem:[#allocation5] sm:$0xff]  ;;  %vm74_vm1 = vcmask 1043456   ;;  %v164_v57 = vlaneseq }
  0x37   :  { %400 = vmatprep.subr.bf16.mxu0 %v522_v0  ;;  %402 = vmatprep.mubr.msk.bf16.mxu0 %vm523_vm0, %v522_v0  ;;  %v59_v2 = vld [vmem:[#allocation2] sm:$0xff]  ;;  %v120_v3 = vld [vmem:[#allocation7 + $0x8] sm:$0xff]  ;;  %v62_v4 = vpack.c.bf16 %v61_v1, %v61_v1  ;;  %v127_v5 = vld [vmem:[#allocation7 + $0x40] sm:$0xff]  ;;  %vm70_vm2 = vcmask 64512   ;;  %v524_v33 = vmov 0   ;;  %vm199_vm3 = vcmask 261120  }
  0x38   :  { %v119_v6 = vld [vmem:[#allocation7] sm:$0xff]  ;;  %v126_v7 = vld [vmem:[#allocation7 + $0x38] sm:$0xff]  ;;  %v148_v8 = vpack.c.bf16 %v127_v5, %v120_v3  ;;  %v129_v11 = vld [vmem:[#allocation7 + $0x50] sm:$0xff]  ;;  %v60_v13 = vpack.c.bf16 %v59_v2, %v59_v2  ;;  %235 = vmatprep.mubr.bf16.mxu1 %v524_v33  ;;  %v165_v58 = vshrl.u32 %v164_v57, 7 }
  0x39   :  { %v147_v9 = vpack.c.bf16 %v126_v7, %v119_v6  ;;  %v122_v10 = vld [vmem:[#allocation7 + $0x18] sm:$0xff]  ;;  %v76_v12 = vsel %vm74_vm1, %v62_v4, 0  ;;  %v121_v15 = vld [vmem:[#allocation7 + $0x10] sm:$0xff]  ;;  %v128_v16 = vld [vmem:[#allocation7 + $0x48] sm:$0xff] }
  0x3a   :  { %v150_v14 = vpack.c.bf16 %v129_v11, %v122_v10  ;;  %401 = vmatpush3.bf16.msra.mxu0 %v76_v12  ;;  %203 = vmatprep.subr.bf16.mxu1 %v148_v8  ;;  %v149_v17 = vpack.c.bf16 %v128_v16, %v121_v15  ;;  %v134_v18 = vld [vmem:[#allocation7 + $0x78] sm:$0xff]  ;;  %v141_v19 = vld [vmem:[#allocation7 + $0xb0] sm:$0xff]  ;;  %v136_v20 = vld [vmem:[#allocation7 + $0x88] sm:$0xff]  ;;  %v166_v59 = vsub.s32 0, %v165_v58  ;;  %v174_v60 = vsub.s32 2, %v165_v58 }
  0x3b   :  { %204 = vmatpush1.bf16.msra.mxu1 %v147_v9  ;;  %v155_v21 = vpack.c.bf16 %v141_v19, %v134_v18  ;;  %v133_v22 = vld [vmem:[#allocation7 + $0x70] sm:$0xff]  ;;  %v140_v23 = vld [vmem:[#allocation7 + $0xa8] sm:$0xff]  ;;  %v143_v24 = vld [vmem:[#allocation7 + $0xc0] sm:$0xff]  ;;  %v170_v62 = vsub.s32 1, %v165_v58  ;;  %v178_v63 = vsub.s32 3, %v165_v58  ;;  %v182_v10 = vsub.s32 4, %v165_v58 }
  0x3c   :  { %244 = vmatprep.subr.bf16.mxu0 %v150_v14  ;;  %v154_v25 = vpack.c.bf16 %v140_v23, %v133_v22  ;;  %v157_v26 = vpack.c.bf16 %v143_v24, %v136_v20  ;;  %v135_v27 = vld [vmem:[#allocation7 + $0x80] sm:$0xff]  ;;  %v142_v28 = vld [vmem:[#allocation7 + $0xb8] sm:$0xff]  ;;  %v124_v30 = vld [vmem:[#allocation7 + $0x28] sm:$0xff]  ;;  %v190_v11 = vsub.s32 6, %v165_v58  ;;  %v186_v16 = vsub.s32 5, %v165_v58 }
  0x3d   :  { %403 = vmatmul.mubr.msk.bf16.vlgmr.msra.gmra.mrb[0].mxu0 %vm70_vm2, %v60_v13  ;;  %205 = vmatprep.subr.bf16.mxu1 %v155_v21  ;;  %v156_v29 = vpack.c.bf16 %v142_v28, %v135_v27  ;;  %v131_v31 = vld [vmem:[#allocation7 + $0x60] sm:$0xff]  ;;  %v389_v34 = vld [vmem:[%s623_s2] ss:$0 sm:$0xff]  ;;  %v130_v39 = vld [vmem:[#allocation7 + $0x58] sm:$0xff] }
  0x3e   :  { %245 = vmatpush1.bf16.msra.mxu0 %v149_v17  ;;  %v152_v32 = vpack.c.bf16 %v131_v31, %v124_v30  ;;  %276 = vmatprep.mubr.bf16.mxu0 %v524_v33  ;;  %v123_v36 = vld [vmem:[#allocation7 + $0x20] sm:$0xff]  ;;  %v125_v40 = vld [vmem:[#allocation7 + $0x30] sm:$0xff]  ;;  %v132_v41 = vld [vmem:[#allocation7 + $0x68] sm:$0xff] }
  0x3f   :  { %206 = vmatpush1.bf16.msra.mxu1 %v154_v25  ;;  %246 = vmatprep.subr.bf16.mxu0 %v157_v26  ;;  %v138_v43 = vld [vmem:[#allocation7 + $0x98] sm:$0xff]  ;;  %v145_v44 = vld [vmem:[#allocation7 + $0xd0] sm:$0xff]  ;;  %v151_v47 = vpack.c.bf16 %v130_v39, %v123_v36  ;;  %v153_v48 = vpack.c.bf16 %v132_v41, %v125_v40  ;;  %v144_v52 = vld [vmem:[#allocation7 + $0xc8] sm:$0xff] }
  0x40   :  { %285 = vmatprep.subr.bf16.mxu1 %v152_v32  ;;  %v137_v49 = vld [vmem:[#allocation7 + $0x90] sm:$0xff]  ;;  %v159_v51 = vpack.c.bf16 %v145_v44, %v138_v43  ;;  %v139_v53 = vld [vmem:[#allocation7 + $0xa0] sm:$0xff]  ;;  %v146_v54 = vld [vmem:[#allocation7 + $0xd8] sm:$0xff] }
  0x41   :  { %v158_v55 = vpack.c.bf16 %v144_v52, %v137_v49  ;;  %v160_v56 = vpack.c.bf16 %v146_v54, %v139_v53  ;;  %v162_v61 = vld [vmem:[%s625_s4] sm:$0xff]  ;;  %s525_s4 = smov [#allocation8]  }
  0x42   :  { %247 = vmatpush1.bf16.msra.mxu0 %v156_v29  ;;  %v167_v1 = vrot.slane %v162_v61, %v166_v59  ;;  %v175_v2 = vrot.slane %v162_v61, %v174_v60  ;;  %v171_v3 = vrot.slane %v162_v61, %v170_v62  ;;  %v183_v19 = vrot.slane %v162_v61, %v182_v10  ;;  %s379_s6 = sshll.u32 %s525_s4, 4  ;;  %s380_s6 = int_to_ptr.vmem [resolvable:$true] %s379_s6 }
  0x43   :  { %406 = vmatprep.subr.bf16.mxu0 %v522_v0  ;;  %v191_v20 = vrot.slane %v162_v61, %v190_v11  ;;  %v187_v21 = vrot.slane %v162_v61, %v186_v16  ;;  %s489_s7 = scalar_lea.vmem %s380_s6, 896  ;;  %p494_p11 = scmp.lt.s32.totalorder %s380_s6, %s380_s6 }
  0x44   :  { %p490_p10 = scmp.ne.s32.totalorder %s380_s6, %s489_s7  ;;  %p495_p12 = scmp.lt.s32.totalorder %s489_s7, %s489_s7 }
  0x46   :  { %p496_p13 = por %p495_p12, %p494_p11 }
  0x48   :  { %p497_p0 = pnand %p496_p13, %p490_p10 }
 0x110   :  { %v112_v35 = vpop.f32.mrb[0].mxu0 }
 0x111   :  { %v113_v37 = vadd.f32 %v389_v34, %v112_v35  ;;  %v404_v38 = vpop.f32.mrb[1].mxu0 }
 0x112   :  { %v115_v42 = vpop.f32.mrb[2].mxu0 }
 0x113   :  { %v118_v45 = vmax.f32 %v113_v37, 0.0  ;;  %v405_v46 = vpop.f32.mrb[3].mxu0 }
 0x115   :  { %v161_v50 = vpack.c.bf16 %v118_v45, %v118_v45 }
 0x117   :  { %391 = vmatmul.mubr.msk.bf16.vlgmr.msra.gmra.mrb[0].mxu1 %vm199_vm3, %v161_v50  ;;  %392 = vmatmul.mubr.msk.bf16.vlgmr.msra.gmra.mrb[4].mxu0 %vm199_vm3, %v161_v50 }
 0x118   :  { %286 = vmatpush1.bf16.msra.mxu1 %v151_v47  ;;  %407 = vmatpush3.bf16.msra.mxu0 %v153_v48 }
 0x119   :  { %287 = vmatprep.subr.bf16.mxu1 %v159_v51  ;;  %408 = vmatprep.subr.bf16.mxu0 %v522_v0 }
 0x11a   :  { %317 = vmatprep.mubr.bf16.mxu1 %v524_v33  ;;  %410 = vmatprep.mubr.msk.bf16.mxu0 %vm523_vm0, %v522_v0  ;;  %v179_v0 = vrot.slane %v162_v61, %v178_v63 }
 0x11c   :  { %288 = vmatpush1.bf16.msra.mxu1 %v158_v55  ;;  %409 = vmatpush3.bf16.msra.mxu0 %v160_v56 }
 0x11f   :  { %393 = vmatmul.mubr.msk.bf16.vlgmr.msra.gmra.mrb[4].mxu1 %vm199_vm3, %v161_v50  ;;  %411 = vmatmul.mubr.msk.bf16.vlgmr.msra.gmra.mrb[8].mxu0 %vm199_vm3, %v161_v50 }
 0x1ea   :  { %v237_v4 = vpop.f32.mrb[0].mxu1  ;;  %v278_v5 = vpop.f32.mrb[4].mxu0 }
 0x1eb   :  { %v238_v6 = vadd.f32 %v237_v4, %v167_v1  ;;  %v279_v7 = vadd.f32 %v278_v5, %v175_v2  ;;  %v239_v8 = vpop.f32.mrb[1].mxu1  ;;  %v280_v9 = vpop.f32.mrb[5].mxu0 }
 0x1ec   :  { %v240_v12 = vadd.f32 %v239_v8, %v171_v3  ;;  %v281_v13 = vadd.f32 %v280_v9, %v179_v0  ;;  %v241_v14 = vpop.f32.mrb[2].mxu1  ;;  %v282_v15 = vpop.f32.mrb[6].mxu0 }
 0x1ed   :  { %366 = vst [vmem:[#allocation8] sm:$0xff] %v238_v6  ;;  %368 = vst [vmem:[#allocation8 + $0x10] sm:$0xff] %v279_v7  ;;  %v242_v17 = vpop.f32.mrb[3].mxu1  ;;  %v283_v18 = vpop.f32.mrb[7].mxu0 }
 0x1ee   :  { %367 = vst [vmem:[#allocation8 + $0x8] sm:$0xff] %v240_v12  ;;  %369 = vst [vmem:[#allocation8 + $0x18] sm:$0xff] %v281_v13 }
 0x1f2   :  { %v319_v22 = vpop.f32.mrb[4].mxu1  ;;  %v360_v23 = vpop.f32.mrb[8].mxu0 }
 0x1f3   :  { %v320_v24 = vadd.f32 %v319_v22, %v183_v19  ;;  %v361_v25 = vadd.f32 %v360_v23, %v191_v20  ;;  %v321_v26 = vpop.f32.mrb[5].mxu1  ;;  %v412_v27 = vpop.f32.mrb[9].mxu0 }
 0x1f4   :  { %v322_v28 = vadd.f32 %v321_v26, %v187_v21  ;;  %v323_v29 = vpop.f32.mrb[6].mxu1  ;;  %v363_v30 = vpop.f32.mrb[10].mxu0 }
 0x1f5   :  { %370 = vst [vmem:[#allocation8 + $0x20] sm:$0xff] %v320_v24  ;;  %372 = vst [vmem:[#allocation8 + $0x30] sm:$0xff] %v361_v25  ;;  %v324_v31 = vpop.f32.mrb[7].mxu1  ;;  %v413_v32 = vpop.f32.mrb[11].mxu0 }
 0x1f6   :  { %371 = vst [vmem:[#allocation8 + $0x28] sm:$0xff] %v322_v28 }
 0x1f7   :  { %500 = shalt.err (!%p497_p0)
}
 0x1f8   :  { %s501_s10 = scalar_lea.hbm %s626_s5, 896 }
 0x1f9   :  { %p502_p1 = scmp.ne.s32.totalorder %s626_s5, %s501_s10  ;;  %p505_p2 = scmp.lt.u32.totalorder %s501_s10, %s626_s5 }
 0x1fb   :  { %p507_p3 = pnand %p505_p2, %p502_p1 }
 0x1fd   :  { %510 = shalt.err (!%p507_p3)
}
 0x1fe   :  { %382 = dma.vmem_to_hbm [thread:$0]  %s380_s6, 896, %s626_s5, [#allocation4]  }
 0x1ff   :  { %515 = dma.done.wait [#allocation4], 896  }
 0x200   :  { %516 = vsyncadd [#allocation4], 4294966400 }
 0x201   :  { %386 = vsyncpa [#allocation3], 1 }
 0x202   :  { %387 = vsyncpa [#allocation6], 1 }
 0x203   :  { %388 = vsyncpa [#allocation4], 1 }

</bundles_post_ra>
